<compile_context>
chip_gen: v5e
topology: v5e:2x2
jax: 0.10.0
libtpu: 0.0.40
codegen_flags: <defaults>
</compile_context>

<pallas_src>
import functools

import jax
import jax.numpy as jnp
from jax.experimental import pallas as pl
from jax.experimental.pallas import tpu as pltpu


def _round_up(x, m):
    return (x + m - 1) // m * m


# ----------------------------- kernel ------------------------------------- #
def _ac_fused_kernel(x_ref, w1_ref, w2_ref, b_ref, out_ref, *, h2p):
    """Fused actor+critic MLP forward for one batch tile.

    x_ref  : (TB, D)           state tile
    w1_ref : (D, H2P)          [wa1 | wc1], zero-padded to 128-multiple lanes
    w2_ref : (H2P, NOUT)       block-diagonal [wa2 ; wc2], lane-dense output
    b_ref  : (1, H2P + NOUT)   packed biases [b1 | b2]
    out_ref: (TB, NOUT)        lanes [0:A] = actor logits, lane A = value
    """
    x = x_ref[...]
    b1 = b_ref[:, :h2p]          # 128-aligned static slices: zero-cost views
    b2 = b_ref[:, h2p:]

    # layer 1 (both heads fused): one MXU matmul, VPU bias + ReLU
    h = jnp.dot(x, w1_ref[...], preferred_element_type=jnp.float32) + b1
    h = jnp.maximum(h, 0.0)

    # layer 2 (both heads fused, lane-dense output slab)
    out = jnp.dot(h, w2_ref[...], preferred_element_type=jnp.float32) + b2
    out_ref[...] = out.astype(out_ref.dtype)


# --------------------------- param packing --------------------------------- #
def pack_params(params):
    """Pack per-head weights into fused, lane-aligned operands."""
    D, H = params["wa1"].shape
    A = params["wa2"].shape[1]
    H2 = 2 * H
    H2P = _round_up(H2, 128)        # fused hidden width, padded to lane multiple
    NOUT = _round_up(A + 1, 128)    # lane-dense output slab width

    # layer 1: [wa1 | wc1] -> [D, H2P]
    w1 = jnp.zeros((D, H2P), jnp.float32)
    w1 = w1.at[:, :H].set(params["wa1"]).at[:, H:H2].set(params["wc1"])
    b1 = jnp.zeros((1, H2P), jnp.float32)
    b1 = b1.at[:, :H].set(params["ba1"]).at[:, H:H2].set(params["bc1"])

    # layer 2: block-diagonal [wa2 ; wc2] -> [H2P, NOUT]
    # (padded rows of h are exactly 0 after ReLU and padded w2 rows are 0,
    #  so the fused matmul is numerically identical to the two-head reference)
    w2 = jnp.zeros((H2P, NOUT), jnp.float32)
    w2 = w2.at[:H, :A].set(params["wa2"]).at[H:H2, A:A + 1].set(params["wc2"])
    b2 = jnp.zeros((1, NOUT), jnp.float32)
    b2 = b2.at[:, :A].set(params["ba2"]).at[:, A:A + 1].set(params["bc2"])

    bias = jnp.concatenate([b1, b2], axis=1)   # single [1, H2P + NOUT] input
    return w1, w2, bias, A, H2P, NOUT


# ------------------------------ wrapper ------------------------------------ #
def actor_critic_forward(state, params, *, tile_b=256):
    """state: [B, D] float32. Returns (action_pred [B, A], value_pred [B, 1])."""
    B, D = state.shape
    w1, w2, bias, A, H2P, NOUT = pack_params(params)

    # batch tile: multiple of 8 sublanes, capped at tile_b rows for VMEM headroom
    tb = min(_round_up(tile_b, 8), _round_up(B, 8))
    Bp = _round_up(B, tb)
    if Bp != B:
        state = jnp.pad(state, ((0, Bp - B), (0, 0)))

    grid = (Bp // tb,)

    out = pl.pallas_call(
        functools.partial(_ac_fused_kernel, h2p=H2P),
        out_shape=jax.ShapeDtypeStruct((Bp, NOUT), jnp.float32),
        grid=grid,
        in_specs=[
            pl.BlockSpec((tb, D), lambda i: (i, 0)),            # state tile (pipelined)
            pl.BlockSpec((D, H2P), lambda i: (0, 0)),           # fused layer-1 W (resident)
            pl.BlockSpec((H2P, NOUT), lambda i: (0, 0)),        # fused layer-2 W (resident)
            pl.BlockSpec((1, H2P + NOUT), lambda i: (0, 0)),    # packed biases (resident)
        ],
        out_specs=pl.BlockSpec((tb, NOUT), lambda i: (i, 0)),   # lane-dense output slab
        compiler_params=pltpu.CompilerParams(
            dimension_semantics=("parallel",),                  # shard batch across TCs (v7x)
        ),
    )(state, w1, w2, bias)

    action_pred = out[:B, :A]
    value_pred = out[:B, A:A + 1]
    return action_pred, value_pred


# --------------------------- init & reference ------------------------------ #
def init_params(key, d_in, hidden, n_actions):
    ks = jax.random.split(key, 8)
    s1 = 1.0 / jnp.sqrt(d_in)
    s2 = 1.0 / jnp.sqrt(hidden)
    return {
        # actor
        "wa1": jax.random.uniform(ks[0], (d_in, hidden), jnp.float32, -s1, s1),
        "ba1": jax.random.uniform(ks[1], (1, hidden), jnp.float32, -s1, s1),
        "wa2": jax.random.uniform(ks[2], (hidden, n_actions), jnp.float32, -s2, s2),
        "ba2": jax.random.uniform(ks[3], (1, n_actions), jnp.float32, -s2, s2),
        # critic
        "wc1": jax.random.uniform(ks[4], (d_in, hidden), jnp.float32, -s1, s1),
        "bc1": jax.random.uniform(ks[5], (1, hidden), jnp.float32, -s1, s1),
        "wc2": jax.random.uniform(ks[6], (hidden, 1), jnp.float32, -s2, s2),
        "bc2": jax.random.uniform(ks[7], (1, 1), jnp.float32, -s2, s2),
    }


def _ref_forward(state, p):
    ha = jnp.maximum(state @ p["wa1"] + p["ba1"], 0.0)
    act = ha @ p["wa2"] + p["ba2"]
    hc = jnp.maximum(state @ p["wc1"] + p["bc1"], 0.0)
    val = hc @ p["wc2"] + p["bc2"]
    return act, val


# -------------------------------- main ------------------------------------- #
if __name__ == "__main__":
    B, D, H, A = 8, 32, 32, 8
    key = jax.random.PRNGKey(0)
    k_state, k_params = jax.random.split(key)

    state = jax.random.normal(k_state, (B, D), dtype=jnp.float32)
    params = init_params(k_params, D, H, A)

    fwd = jax.jit(actor_critic_forward)
    action_pred, value_pred = fwd(state, params)
    jax.block_until_ready((action_pred, value_pred))

    # correctness check against pure-JAX reference
    ref_act, ref_val = _ref_forward(state, params)
    assert action_pred.shape == (B, A)
    assert value_pred.shape == (B, 1)
    assert jnp.allclose(action_pred, ref_act, atol=1e-5, rtol=1e-5)
    assert jnp.allclose(value_pred, ref_val, atol=1e-5, rtol=1e-5)

    print("KERNEL_OK")
</pallas_src>

<mosaic_0001>
module attributes {stable_mosaic.version = 11 : i64} {
  func.func @_ac_fused_kernel(%arg0: i32, %arg1: memref<8x32xf32, #tpu.memory_space<vmem>>, %arg2: memref<32x128xf32, #tpu.memory_space<vmem>>, %arg3: memref<128x128xf32, #tpu.memory_space<vmem>>, %arg4: memref<1x256xf32, #tpu.memory_space<vmem>>, %arg5: memref<8x128xf32, #tpu.memory_space<vmem>>) attributes {dimension_semantics = [#tpu.dimension_semantics<parallel>], iteration_bounds = array<i64: 1>, scalar_prefetch = 0 : i64, scratch_operands = 0 : i64, tpu.core_type = #tpu.core_type<tc>, window_params = [{transform_indices = @transform_0, window_bounds = array<i64: 8, 32>}, {pipeline_mode = #tpu.pipeline_mode<synchronous>, transform_indices = @transform_1, window_bounds = array<i64: 32, 128>}, {pipeline_mode = #tpu.pipeline_mode<synchronous>, transform_indices = @transform_2, window_bounds = array<i64: 128, 128>}, {pipeline_mode = #tpu.pipeline_mode<synchronous>, transform_indices = @transform_3, window_bounds = array<i64: 1, 256>}, {transform_indices = @transform_4, window_bounds = array<i64: 8, 128>}]} {
    %c0 = arith.constant 0 : index
    %c0_0 = arith.constant 0 : index
    %0 = vector.load %arg1[%c0, %c0_0] : memref<8x32xf32, #tpu.memory_space<vmem>>, vector<8x32xf32>
    %c0_1 = arith.constant 0 : index
    %c0_2 = arith.constant 0 : index
    %1 = vector.load %arg4[%c0_1, %c0_2] : memref<1x256xf32, #tpu.memory_space<vmem>>, vector<1x128xf32>
    %c0_3 = arith.constant 0 : index
    %c128 = arith.constant 128 : index
    %2 = vector.load %arg4[%c0_3, %c128] : memref<1x256xf32, #tpu.memory_space<vmem>>, vector<1x128xf32>
    %c0_4 = arith.constant 0 : index
    %c0_5 = arith.constant 0 : index
    %3 = vector.load %arg2[%c0_4, %c0_5] : memref<32x128xf32, #tpu.memory_space<vmem>>, vector<32x128xf32>
    %cst = arith.constant dense<0.000000e+00> : vector<8x128xf32>
    %4 = tpu.matmul %0, %3, %cst {dimension_numbers = #tpu.dot_dimension_numbers<[1], [0], [0], [1], [0, 0, 1, 1], [], []>} : vector<8x32xf32>, vector<32x128xf32>, vector<8x128xf32> -> vector<8x128xf32>
    %5 = vector.broadcast %1 : vector<1x128xf32> to vector<8x128xf32>
    %6 = arith.addf %4, %5 : vector<8x128xf32>
    %cst_6 = arith.constant 0.000000e+00 : f32
    %7 = vector.broadcast %cst_6 : f32 to vector<8x128xf32>
    %8 = arith.maximumf %6, %7 : vector<8x128xf32>
    %c0_7 = arith.constant 0 : index
    %c0_8 = arith.constant 0 : index
    %9 = vector.load %arg3[%c0_7, %c0_8] : memref<128x128xf32, #tpu.memory_space<vmem>>, vector<128x128xf32>
    %cst_9 = arith.constant dense<0.000000e+00> : vector<8x128xf32>
    %10 = tpu.matmul %8, %9, %cst_9 {dimension_numbers = #tpu.dot_dimension_numbers<[1], [0], [0], [1], [0, 0, 1, 1], [], []>} : vector<8x128xf32>, vector<128x128xf32>, vector<8x128xf32> -> vector<8x128xf32>
    %11 = vector.broadcast %2 : vector<1x128xf32> to vector<8x128xf32>
    %12 = arith.addf %10, %11 : vector<8x128xf32>
    %c0_10 = arith.constant 0 : index
    %c0_11 = arith.constant 0 : index
    %13 = vector.load %arg5[%c0_10, %c0_11] : memref<8x128xf32, #tpu.memory_space<vmem>>, vector<8x128xf32>
    tpu.vector_store %arg5[%c0_10, %c0_11], %12 {strides = array<i32>} : memref<8x128xf32, #tpu.memory_space<vmem>>, vector<8x128xf32>,
    return
  }
  func.func @transform_0(%arg0: i32) -> (i32, i32) {
    %c0_i32 = arith.constant 0 : i32
    %c0_i32_0 = arith.constant 0 : i32
    return %arg0, %c0_i32 : i32, i32
  }
  func.func @transform_1(%arg0: i32) -> (i32, i32) {
    %c0_i32 = arith.constant 0 : i32
    %c0_i32_0 = arith.constant 0 : i32
    %c0_i32_1 = arith.constant 0 : i32
    return %c0_i32, %c0_i32_0 : i32, i32
  }
  func.func @transform_2(%arg0: i32) -> (i32, i32) {
    %c0_i32 = arith.constant 0 : i32
    %c0_i32_0 = arith.constant 0 : i32
    %c0_i32_1 = arith.constant 0 : i32
    return %c0_i32, %c0_i32_0 : i32, i32
  }
  func.func @transform_3(%arg0: i32) -> (i32, i32) {
    %c0_i32 = arith.constant 0 : i32
    %c0_i32_0 = arith.constant 0 : i32
    %c0_i32_1 = arith.constant 0 : i32
    return %c0_i32, %c0_i32_0 : i32, i32
  }
  func.func @transform_4(%arg0: i32) -> (i32, i32) {
    %c0_i32 = arith.constant 0 : i32
    %c0_i32_0 = arith.constant 0 : i32
    return %arg0, %c0_i32 : i32, i32
  }
}

</mosaic_0001>

<bundles_post_ra>
// kernel: actor_critic_forward.1
= control target key start
LH: loop header
LB: loop body
LE: loop exit
PB: predicated region body
PF: predicated region fallthrough
CT: control target
= control target key end

     0   :  { %vm27_vm0 = vcmask 261120   ;;  %s196_s1 = inlined_call_operand.vmem [shape: f32[32,128], index: 1, kind: input, shape index: {}]   ;;  %s197_s2 = inlined_call_operand.vmem [shape: f32[128,128], index: 2, kind: input, shape index: {}]   ;;  %s198_s0 = inlined_call_operand.vmem [shape: f32[8,32], index: 0, kind: input, shape index: {}]   ;;  %s199_s3 = inlined_call_operand.vmem [shape: f32[1,256], index: 3, kind: input, shape index: {}]   ;;  %s200_s4 = inlined_call_operand.vmem [shape: f32[8,128], index: 4, kind: output, shape index: {}]  }
   0x1   :  { %v23_v0 = vld [vmem:[%s196_s1 + $0x18] sm:$0xff]  ;;  %v22_v1 = vld [vmem:[%s196_s1 + $0x10] sm:$0xff]  ;;  %v21_v3 = vld [vmem:[%s196_s1 + $0x8] sm:$0xff] }
   0x2   :  { %43 = vmatpush.msra.mxu0 %v23_v0  ;;  %v67_v2 = vld [vmem:[%s197_s2 + $0x78] sm:$0xff]  ;;  %v66_v4 = vld [vmem:[%s197_s2 + $0x70] sm:$0xff]  ;;  %v65_v5 = vld [vmem:[%s197_s2 + $0x68] sm:$0xff] }
   0x3   :  { %71 = vmatpush.msra.mxu1 %v67_v2  ;;  %v20_v6 = vld [vmem:[%s196_s1] sm:$0xff]  ;;  %v63_v9 = vld [vmem:[%s197_s2 + $0x58] sm:$0xff]  ;;  %v62_v10 = vld [vmem:[%s197_s2 + $0x50] sm:$0xff] }
   0x4   :  { %44 = vmatpush.msra.mxu0 %v22_v1  ;;  %v17_v7 = vld [vmem:[%s198_s0] sm:$0xff]  ;;  %v61_v11 = vld [vmem:[%s197_s2 + $0x48] sm:$0xff]  ;;  %v59_v13 = vld [vmem:[%s197_s2 + $0x38] sm:$0xff] }
   0x5   :  { %72 = vmatpush.msra.mxu1 %v66_v4  ;;  %v64_v8 = vld [vmem:[%s197_s2 + $0x60] sm:$0xff]  ;;  %v58_v14 = vld [vmem:[%s197_s2 + $0x30] sm:$0xff]  ;;  %v57_v15 = vld [vmem:[%s197_s2 + $0x28] sm:$0xff] }
   0x6   :  { %45 = vmatpush.msra.mxu0 %v21_v3  ;;  %v60_v12 = vld [vmem:[%s197_s2 + $0x40] sm:$0xff]  ;;  %v55_v17 = vld [vmem:[%s197_s2 + $0x18] sm:$0xff]  ;;  %v54_v18 = vld [vmem:[%s197_s2 + $0x10] sm:$0xff] }
   0x7   :  { %73 = vmatpush.msra.mxu1 %v65_v5  ;;  %v56_v16 = vld [vmem:[%s197_s2 + $0x20] sm:$0xff]  ;;  %v53_v19 = vld [vmem:[%s197_s2 + $0x8] sm:$0xff] }
   0x8   :  { %46 = vmatpush.msra.mxu0 %v20_v6  ;;  %v52_v20 = vld [vmem:[%s197_s2] sm:$0xff] }
   0x9   :  { %96 = vmatmul.msk.f32.vlgmr.msra.gmra.mxu0 %vm27_vm0, %v17_v7  ;;  %74 = vmatpush.msra.mxu1 %v64_v8  ;;  %v97_v21 = vld [vmem:[%s199_s3] ss:$0 sm:$0xff]  ;;  %v98_v25 = vld [vmem:[%s199_s3 + $0x1] ss:$0 sm:$0xff] }
   0xb   :  { %75 = vmatpush.msra.mxu1 %v63_v9 }
   0xd   :  { %76 = vmatpush.msra.mxu1 %v62_v10 }
   0xf   :  { %77 = vmatpush.msra.mxu1 %v61_v11 }
  0x11   :  { %78 = vmatpush.msra.mxu1 %v60_v12 }
  0x13   :  { %79 = vmatpush.msra.mxu1 %v59_v13 }
  0x15   :  { %80 = vmatpush.msra.mxu1 %v58_v14 }
  0x17   :  { %81 = vmatpush.msra.mxu1 %v57_v15 }
  0x19   :  { %82 = vmatpush.msra.mxu1 %v56_v16 }
  0x1b   :  { %83 = vmatpush.msra.mxu1 %v55_v17 }
  0x1d   :  { %84 = vmatpush.msra.mxu1 %v54_v18 }
  0x1f   :  { %85 = vmatpush.msra.mxu1 %v53_v19 }
  0x21   :  { %86 = vmatpush.msra.mxu1 %v52_v20 }
  0x86   :  { %v48_v22 = vpop.f32.mrf.mxu0 }
  0x87   :  { %v49_v23 = vadd.f32 %v97_v21, %v48_v22 }
  0x89   :  { %v51_v24 = vmax.f32 %v49_v23, 0.0 }
  0x8b   :  { %87 = vmatmul.f32.vlgmr.msra.gmra.mxu1 %v51_v24 }
 0x108   :  { %v88_v26 = vpop.f32.mrf.mxu1 }
 0x109   :  { %v89_v27 = vadd.f32 %v98_v25, %v88_v26 }
 0x10b   :  { %91 = vst [vmem:[%s200_s4] sm:$0xff] %v89_v27 }

</bundles_post_ra>
